<compile_context>
chip_gen: v6e
topology: v6e:2x2x1
jax: 0.10.0
libtpu: 0.0.40
codegen_flags: <defaults>
</compile_context>

<pallas_src>
import functools

import jax
import jax.numpy as jnp
from jax.experimental import pallas as pl
from jax.experimental.pallas import tpu as pltpu


def _round_up(n, m):
    return ((n + m - 1) // m) * m


def qnetwork_kernel(x_ref, w1_ref, b1_ref, w2_ref, b2_ref, w3_ref, b3_ref, o_ref):
    # In-kernel cast to bf16 for the MXU (VPU work, hidden under matmul push).
    x = x_ref[...].astype(jnp.bfloat16)
    # Hidden layer 1: ReLU(x @ W1 + b1)  -- bf16 MXU operands, f32 accumulate.
    h = jnp.dot(x, w1_ref[...], preferred_element_type=jnp.float32)
    h = jnp.maximum(h + b1_ref[...], 0.0)                      # f32 VPU
    # Hidden layer 2: ReLU(h @ W2 + b2)
    h = jnp.dot(h.astype(w2_ref.dtype), w2_ref[...],
                preferred_element_type=jnp.float32)
    h = jnp.maximum(h + b2_ref[...], 0.0)                      # f32 VPU
    # Output layer (logits, no activation)
    out = jnp.dot(h.astype(w3_ref.dtype), w3_ref[...],
                  preferred_element_type=jnp.float32)
    # TODO(synk): on v5e (single vector-store slot) a lane-dense output fold
    # (tile, 8) -> (tile//16, 128) would avoid masked vst; skipped here since
    # on v6e/v7x the store path hides under the MXU cadence.
    o_ref[...] = (out + b3_ref[...]).astype(o_ref.dtype)


def _qnetwork_pallas(x, params, tile_b):
    """Pallas path.  x: (B, input_size) f32."""
    w1, b1, w2, b2, w3, b3 = (
        params["w1"], params["b1"], params["w2"],
        params["b2"], params["w3"], params["b3"],
    )
    B = x.shape[0]
    in_size, h1 = w1.shape
    h2 = w2.shape[1]
    out_size = w3.shape[1]

    # Weights to bf16 for the MXU (tiny, VMEM-resident).  Biases stay f32.
    bf = jnp.bfloat16
    w1b, w2b, w3b = w1.astype(bf), w2.astype(bf), w3.astype(bf)

    # Batch tile: multiple of 16, capped.  Last block may be ragged; Pallas
    # drops the out-of-bounds stores of that block.
    tile = max(16, min(tile_b, _round_up(B, 16)))
    grid = (pl.cdiv(B, tile),)

    flops = 2 * B * (in_size * h1 + h1 * h2 + h2 * out_size)
    bytes_accessed = (
        B * in_size * 4                 # x (f32 read)
        + B * out_size * 4              # out (f32 write)
        + (w1b.size + w2b.size + w3b.size) * 2
        + (b1.size + b2.size + b3.size) * 4
    )

    out = pl.pallas_call(
        qnetwork_kernel,
        out_shape=jax.ShapeDtypeStruct((B, out_size), jnp.float32),
        grid=grid,
        in_specs=[
            pl.BlockSpec((tile, in_size), lambda i: (i, 0)),   # x: batch-tiled, f32
            pl.BlockSpec((in_size, h1), lambda i: (0, 0)),     # W1: resident
            pl.BlockSpec((1, h1), lambda i: (0, 0)),           # b1: resident
            pl.BlockSpec((h1, h2), lambda i: (0, 0)),          # W2: resident
            pl.BlockSpec((1, h2), lambda i: (0, 0)),           # b2: resident
            pl.BlockSpec((h2, out_size), lambda i: (0, 0)),    # W3: resident
            pl.BlockSpec((1, out_size), lambda i: (0, 0)),     # b3: resident
        ],
        out_specs=pl.BlockSpec((tile, out_size), lambda i: (i, 0)),
        compiler_params=pltpu.CompilerParams(
            # TODO(synk): on v7x verify via xprof that both TensorCores pick
            # up the batch grid; if not, switch to pltpu.CORE_PARALLEL.
            dimension_semantics=("parallel",),
        ),
        cost_estimate=pl.CostEstimate(
            flops=flops, transcendentals=0, bytes_accessed=bytes_accessed),
    )(x, w1b, b1, w2b, b2, w3b, b3)
    # TODO(synk): for tiles <= 256 (small-batch serving) pipeline_mode=
    # pl.Buffered(3) on x/out would hide HBM latency; not needed at the
    # default tile of 2048.
    return out


def _qnetwork_xla(x, params):
    """Fused XLA path (bf16 operands / f32 accumulate) for small batches."""
    bf = jnp.bfloat16
    h = jnp.dot(x.astype(bf), params["w1"].astype(bf),
                preferred_element_type=jnp.float32)
    h = jnp.maximum(h + params["b1"], 0.0)
    h = jnp.dot(h.astype(bf), params["w2"].astype(bf),
                preferred_element_type=jnp.float32)
    h = jnp.maximum(h + params["b2"], 0.0)
    return jnp.dot(h.astype(bf), params["w3"].astype(bf),
                   preferred_element_type=jnp.float32) + params["b3"]


@functools.partial(jax.jit, static_argnames=("tile_b", "min_pallas_batch"))
def qnetwork_forward(x, params, *, tile_b=2048, min_pallas_batch=1024):
    """x: (B, input_size) float32. params: dict of f32 weights/biases.

    Batches smaller than `min_pallas_batch` rows use a plain fused XLA path
    (same numerics); larger batches use the Pallas kernel.
    """
    if x.shape[0] < min_pallas_batch:
        return _qnetwork_xla(x, params)
    return _qnetwork_pallas(x, params, tile_b)


def init_qnetwork_params(key, input_size, output_size, hidden_layers=(64, 64)):
    """Deterministic init mimicking PyTorch nn.Linear default:
    U(-1/sqrt(fan_in), 1/sqrt(fan_in)) for both weight and bias."""
    sizes = [input_size] + list(hidden_layers) + [output_size]
    params = {}
    names = ["1", "2", "3"]
    for i, (fan_in, fan_out) in enumerate(zip(sizes[:-1], sizes[1:])):
        key, kw, kb = jax.random.split(key, 3)
        bound = 1.0 / jnp.sqrt(float(fan_in))
        # stored as (in, out) so the kernel does x @ W
        params["w" + names[i]] = jax.random.uniform(
            kw, (fan_in, fan_out), jnp.float32, -bound, bound)
        params["b" + names[i]] = jax.random.uniform(
            kb, (1, fan_out), jnp.float32, -bound, bound)
    return params


def qnetwork_ref_f32(x, params):
    """Pure-f32 JAX reference of the same forward pass."""
    h = jnp.maximum(x @ params["w1"] + params["b1"], 0.0)
    h = jnp.maximum(h @ params["w2"] + params["b2"], 0.0)
    return h @ params["w3"] + params["b3"]


def qnetwork_ref_bf16(x, params):
    """Reference mirroring the kernel's bf16-operand / f32-accumulate path."""
    return _qnetwork_xla(x, params)


if __name__ == "__main__":
    input_size, output_size = 32, 8
    hidden_layers = [64, 64]
    # Small, but exercises a multi-step batch grid (2 full tiles of 128 plus a
    # ragged 44-row tail block -> tests OOB-store dropping).
    batch = 300

    key = jax.random.PRNGKey(0)
    kx, kp = jax.random.split(key)
    x = jax.random.normal(kx, (batch, input_size), jnp.float32)
    params = init_qnetwork_params(kp, input_size, output_size, hidden_layers)

    # Force the Pallas kernel path (default dispatch would send B=300 to XLA).
    out = qnetwork_forward(x, params, tile_b=128, min_pallas_batch=0)
    out = jax.block_until_ready(out)

    assert out.shape == (batch, output_size)
    # Tight check vs. the bf16-mirrored reference, looser check vs. pure f32.
    ref_bf16 = qnetwork_ref_bf16(x, params)
    ref_f32 = qnetwork_ref_f32(x, params)
    assert jnp.allclose(out, ref_bf16, atol=1e-2, rtol=1e-2)
    assert jnp.allclose(out, ref_f32, atol=5e-2, rtol=5e-2)

    # Also exercise the default small-batch XLA dispatch once.
    out_small = jax.block_until_ready(qnetwork_forward(x, params))
    assert jnp.allclose(out_small, ref_bf16, atol=1e-2, rtol=1e-2)

    print("KERNEL_OK")
</pallas_src>

<mosaic_0001>
module attributes {stable_mosaic.version = 11 : i64} {
  func.func @qnetwork_kernel(%arg0: i32, %arg1: memref<128x32xf32, #tpu.memory_space<vmem>>, %arg2: memref<32x64xbf16, #tpu.memory_space<vmem>>, %arg3: memref<1x64xf32, #tpu.memory_space<vmem>>, %arg4: memref<64x64xbf16, #tpu.memory_space<vmem>>, %arg5: memref<1x64xf32, #tpu.memory_space<vmem>>, %arg6: memref<64x8xbf16, #tpu.memory_space<vmem>>, %arg7: memref<1x8xf32, #tpu.memory_space<vmem>>, %arg8: memref<128x8xf32, #tpu.memory_space<vmem>>) attributes {dimension_semantics = [#tpu.dimension_semantics<parallel>], iteration_bounds = array<i64: 3>, scalar_prefetch = 0 : i64, scratch_operands = 0 : i64, tpu.core_type = #tpu.core_type<tc>, window_params = [{transform_indices = @transform_0, window_bounds = array<i64: 128, 32>}, {pipeline_mode = #tpu.pipeline_mode<synchronous>, transform_indices = @transform_1, window_bounds = array<i64: 32, 64>}, {pipeline_mode = #tpu.pipeline_mode<synchronous>, transform_indices = @transform_2, window_bounds = array<i64: 1, 64>}, {pipeline_mode = #tpu.pipeline_mode<synchronous>, transform_indices = @transform_3, window_bounds = array<i64: 64, 64>}, {pipeline_mode = #tpu.pipeline_mode<synchronous>, transform_indices = @transform_4, window_bounds = array<i64: 1, 64>}, {pipeline_mode = #tpu.pipeline_mode<synchronous>, transform_indices = @transform_5, window_bounds = array<i64: 64, 8>}, {pipeline_mode = #tpu.pipeline_mode<synchronous>, transform_indices = @transform_6, window_bounds = array<i64: 1, 8>}, {transform_indices = @transform_7, window_bounds = array<i64: 128, 8>}]} {
    %c0 = arith.constant 0 : index
    %c0_0 = arith.constant 0 : index
    %0 = vector.load %arg1[%c0, %c0_0] : memref<128x32xf32, #tpu.memory_space<vmem>>, vector<128x32xf32>
    %1 = arith.truncf %0 : vector<128x32xf32> to vector<128x32xbf16>
    %c0_1 = arith.constant 0 : index
    %c0_2 = arith.constant 0 : index
    %2 = vector.load %arg2[%c0_1, %c0_2] : memref<32x64xbf16, #tpu.memory_space<vmem>>, vector<32x64xbf16>
    %cst = arith.constant dense<0.000000e+00> : vector<128x64xf32>
    %3 = tpu.matmul %1, %2, %cst {dimension_numbers = #tpu.dot_dimension_numbers<[1], [0], [0], [1], [0, 0, 1, 1], [], []>} : vector<128x32xbf16>, vector<32x64xbf16>, vector<128x64xf32> -> vector<128x64xf32>
    %c0_3 = arith.constant 0 : index
    %c0_4 = arith.constant 0 : index
    %4 = vector.load %arg3[%c0_3, %c0_4] : memref<1x64xf32, #tpu.memory_space<vmem>>, vector<1x64xf32>
    %5 = vector.broadcast %4 : vector<1x64xf32> to vector<128x64xf32>
    %6 = arith.addf %3, %5 : vector<128x64xf32>
    %cst_5 = arith.constant 0.000000e+00 : f32
    %7 = vector.broadcast %cst_5 : f32 to vector<128x64xf32>
    %8 = arith.maximumf %6, %7 : vector<128x64xf32>
    %9 = arith.truncf %8 : vector<128x64xf32> to vector<128x64xbf16>
    %c0_6 = arith.constant 0 : index
    %c0_7 = arith.constant 0 : index
    %10 = vector.load %arg4[%c0_6, %c0_7] : memref<64x64xbf16, #tpu.memory_space<vmem>>, vector<64x64xbf16>
    %cst_8 = arith.constant dense<0.000000e+00> : vector<128x64xf32>
    %11 = tpu.matmul %9, %10, %cst_8 {dimension_numbers = #tpu.dot_dimension_numbers<[1], [0], [0], [1], [0, 0, 1, 1], [], []>} : vector<128x64xbf16>, vector<64x64xbf16>, vector<128x64xf32> -> vector<128x64xf32>
    %c0_9 = arith.constant 0 : index
    %c0_10 = arith.constant 0 : index
    %12 = vector.load %arg5[%c0_9, %c0_10] : memref<1x64xf32, #tpu.memory_space<vmem>>, vector<1x64xf32>
    %13 = vector.broadcast %12 : vector<1x64xf32> to vector<128x64xf32>
    %14 = arith.addf %11, %13 : vector<128x64xf32>
    %cst_11 = arith.constant 0.000000e+00 : f32
    %15 = vector.broadcast %cst_11 : f32 to vector<128x64xf32>
    %16 = arith.maximumf %14, %15 : vector<128x64xf32>
    %17 = arith.truncf %16 : vector<128x64xf32> to vector<128x64xbf16>
    %c0_12 = arith.constant 0 : index
    %c0_13 = arith.constant 0 : index
    %18 = vector.load %arg6[%c0_12, %c0_13] : memref<64x8xbf16, #tpu.memory_space<vmem>>, vector<64x8xbf16>
    %cst_14 = arith.constant dense<0.000000e+00> : vector<128x8xf32>
    %19 = tpu.matmul %17, %18, %cst_14 {dimension_numbers = #tpu.dot_dimension_numbers<[1], [0], [0], [1], [0, 0, 1, 1], [], []>} : vector<128x64xbf16>, vector<64x8xbf16>, vector<128x8xf32> -> vector<128x8xf32>
    %c0_15 = arith.constant 0 : index
    %c0_16 = arith.constant 0 : index
    %20 = vector.load %arg7[%c0_15, %c0_16] : memref<1x8xf32, #tpu.memory_space<vmem>>, vector<1x8xf32>
    %21 = vector.broadcast %20 : vector<1x8xf32> to vector<128x8xf32>
    %22 = arith.addf %19, %21 : vector<128x8xf32>
    %c0_17 = arith.constant 0 : index
    %c0_18 = arith.constant 0 : index
    %23 = vector.load %arg8[%c0_17, %c0_18] : memref<128x8xf32, #tpu.memory_space<vmem>>, vector<128x8xf32>
    tpu.vector_store %arg8[%c0_17, %c0_18], %22 {strides = array<i32>} : memref<128x8xf32, #tpu.memory_space<vmem>>, vector<128x8xf32>,
    return
  }
  func.func @transform_0(%arg0: i32) -> (i32, i32) {
    %c0_i32 = arith.constant 0 : i32
    %c0_i32_0 = arith.constant 0 : i32
    return %arg0, %c0_i32 : i32, i32
  }
  func.func @transform_1(%arg0: i32) -> (i32, i32) {
    %c0_i32 = arith.constant 0 : i32
    %c0_i32_0 = arith.constant 0 : i32
    %c0_i32_1 = arith.constant 0 : i32
    return %c0_i32, %c0_i32_0 : i32, i32
  }
  func.func @transform_2(%arg0: i32) -> (i32, i32) {
    %c0_i32 = arith.constant 0 : i32
    %c0_i32_0 = arith.constant 0 : i32
    %c0_i32_1 = arith.constant 0 : i32
    return %c0_i32, %c0_i32_0 : i32, i32
  }
  func.func @transform_3(%arg0: i32) -> (i32, i32) {
    %c0_i32 = arith.constant 0 : i32
    %c0_i32_0 = arith.constant 0 : i32
    %c0_i32_1 = arith.constant 0 : i32
    return %c0_i32, %c0_i32_0 : i32, i32
  }
  func.func @transform_4(%arg0: i32) -> (i32, i32) {
    %c0_i32 = arith.constant 0 : i32
    %c0_i32_0 = arith.constant 0 : i32
    %c0_i32_1 = arith.constant 0 : i32
    return %c0_i32, %c0_i32_0 : i32, i32
  }
  func.func @transform_5(%arg0: i32) -> (i32, i32) {
    %c0_i32 = arith.constant 0 : i32
    %c0_i32_0 = arith.constant 0 : i32
    %c0_i32_1 = arith.constant 0 : i32
    return %c0_i32, %c0_i32_0 : i32, i32
  }
  func.func @transform_6(%arg0: i32) -> (i32, i32) {
    %c0_i32 = arith.constant 0 : i32
    %c0_i32_0 = arith.constant 0 : i32
    %c0_i32_1 = arith.constant 0 : i32
    return %c0_i32, %c0_i32_0 : i32, i32
  }
  func.func @transform_7(%arg0: i32) -> (i32, i32) {
    %c0_i32 = arith.constant 0 : i32
    %c0_i32_0 = arith.constant 0 : i32
    return %arg0, %c0_i32 : i32, i32
  }
}

</mosaic_0001>

<bundles_post_ra>
// kernel: qnetwork_forward.1
= control target key start
LH: loop header
LB: loop body
LE: loop exit
PB: predicated region body
PF: predicated region fallthrough
CT: control target
= control target key end

     0   :  { %s1528_s24 = smov 0   ;;  %s1530_s25 = smov 0   ;;  %s1781_s0 = inlined_call_operand.vmem [shape: f32[300,32], index: 0, kind: input, shape index: {}]   ;;  %s1782_s1 = inlined_call_operand.vmem [shape: bf16[32,64], index: 1, kind: input, shape index: {}]   ;;  %s1783_s2 = inlined_call_operand.vmem [shape: f32[1,64], index: 2, kind: input, shape index: {}]   ;;  %s1784_s3 = inlined_call_operand.vmem [shape: bf16[64,64], index: 3, kind: input, shape index: {}]   ;;  %s1785_s4 = inlined_call_operand.vmem [shape: f32[1,64], index: 4, kind: input, shape index: {}]   ;;  %s1786_s5 = inlined_call_operand.vmem [shape: bf16[64,8], index: 5, kind: input, shape index: {}]   ;;  %s1787_s6 = inlined_call_operand.vmem [shape: f32[1,8], index: 6, kind: input, shape index: {}]   ;;  %s1788_s7 = inlined_call_operand.vmem [shape: f32[300,8], index: 7, kind: output, shape index: {}]  }
   0x1   :  { %s1532_s26 = smov 0  }
   0x2 LB: > { %s1541_s27 = sadd.s32 4294967295, %s1454_s26   ;;  %s1543_s28 = sadd.s32 1, %s1454_s26   ;;  %s1454_s26 = sphi %s1532_s26, %s1795_s26   ;;  %s1450_s25 = sphi %s1530_s25, %s1794_s25   ;;  %s1446_s24 = sphi %s1528_s24, %s1793_s24  }
   0x3   : > { %s173_s29 = ssub.s32 %s1454_s26, %s1543_s28  ;;  %s176_s30 = sadd.s32 1, %s1450_s25 }
   0x4   : > { %p174_p0 = scmp.eq.s32.totalorder %s173_s29, 0  ;;  %p186_p1 = scmp.ne.s32.totalorder %s1450_s25, %s1446_s24 }
   0x5   : > { %p187_p2 = scmp.eq.s32.totalorder %s1541_s27, 2  ;;  %p1135_p3 = scmp.ge.s32.totalorder %s1454_s26, 1 }
   0x6   : > { %s1551_s8 = scalar_select %p174_p0, %s1450_s25, %s176_s30  }
   0x7   : > { %p1553_p4 = por %p187_p2, %p186_p1  ;;  %p246_p5 = scmp.lt.s32.totalorder %s1454_s26, 4 }
   0x9   : > { %p247_p6 = pnand %p1135_p3, %p246_p5 }
   0xa   : > { %s1561_s12 = sshll.u32 (!%p247_p6), %s1541_s27, 4  ;;  %s278_s26 = sand.u32 (!%p247_p6), 1, %s1446_s24  }
   0xb   : > { %250 = sbr.rel (%p247_p6) target bundleno = 704 (0x2c0), region = 48  ;;  %p286_p7 = scmp.lt.s32.totalorder (!%p247_p6), %s1561_s12, 37 }
   0xc   : > { %s1136_s29 = sshll.u32 (!%p247_p6), %s278_s26, 7 }
   0xd   : > { %s1647_s11 = scalar_lea.vmem (!%p247_p6), [#allocation2], %s1136_s29  }
  0x10   : > { %v1390_v0 = vld [vmem:[%s1782_s1 + $0x8] sm:$0xff]   ;;  %v1391_v1 = vld [vmem:[%s1782_s1] sm:$0xff]   ;;  %s287_s15 = scalar_select %p286_p7, %s1561_s12, 37  ;;  %v1392_v2 = vld [vmem:[%s1784_s3 + $0x18] sm:$0xff]   ;;  %vm348_vm0 = vcmask 261120   ;;  %vm533_vm1 = vcmask 523264  }
  0x11   : > { %1230 = vmatprep.subr.bf16.mxu0 %v1390_v0  ;;  %1298 = vmatprep.subr.bf16.mxu1 %v1390_v0  ;;  %v1393_v27 = vld [vmem:[%s1784_s3 + $0x10] sm:$0xff]   ;;  %v1394_v28 = vld [vmem:[%s1784_s3 + $0x8] sm:$0xff]   ;;  %v1395_v29 = vld [vmem:[%s1784_s3] sm:$0xff]   ;;  %vm839_vm2 = vcmask 64512   ;;  %s864_s24 = ssub.s32 (%p1553_p4), 38, %s1561_s12  ;;  %s1193_s13 = sshll.u32 (%p1553_p4), %s1541_s27, 7 }
  0x12   : > { %1231 = vmatpush3.bf16.msra.mxu0 %v1390_v0  ;;  %1300 = vmatpush3.bf16.msra.mxu1 %v1390_v0  ;;  %s1138_s18 = sshll.u32 %s287_s15, 3  ;;  %v1396_v30 = vld [vmem:[%s1786_s5 + $0x18] sm:$0xff]   ;;  %v1139_v33 = vld [vmem:[%s1783_s2] ss:$0 sm:$0xff]  ;;  %p865_p8 = scmp.lt.s32.totalorder (%p1553_p4), %s864_s24, 16 }
  0x13   : > { %1232 = vmatprep.subr.bf16.mxu0 %v1391_v1  ;;  %1299 = vmatprep.subr.bf16.mxu1 %v1391_v1  ;;  %s1574_s21 = scalar_lea.vmem %s1781_s0, %s1138_s18  ;;  %s1688_s16 = scalar_lea.vmem (%p1553_p4), %s1788_s7, %s1193_s13  }
  0x14   : > { %v301_v3 = vld [vmem:[%s1574_s21] sm:$0xff]  ;;  %v302_v4 = vld [vmem:[%s1574_s21 + $0x8] sm:$0xff]  ;;  %v303_v5 = vld [vmem:[%s1574_s21 + $0x10] sm:$0xff] }
  0x15   : > { %v317_v6 = vpack.c.bf16 %v302_v4, %v301_v3  ;;  %v304_v7 = vld [vmem:[%s1574_s21 + $0x18] sm:$0xff]  ;;  %v305_v8 = vld [vmem:[%s1574_s21 + $0x20] sm:$0xff]  ;;  %v306_v9 = vld [vmem:[%s1574_s21 + $0x28] sm:$0xff] }
  0x16   : > { %1233 = vmatpush3.bf16.msra.mxu0 %v1391_v1  ;;  %1301 = vmatpush3.bf16.msra.mxu1 %v1391_v1  ;;  %v318_v10 = vpack.c.bf16 %v304_v7, %v303_v5  ;;  %v319_v11 = vpack.c.bf16 %v306_v9, %v305_v8  ;;  %v309_v12 = vld [vmem:[%s1574_s21 + $0x40] sm:$0xff]  ;;  %v310_v13 = vld [vmem:[%s1574_s21 + $0x48] sm:$0xff]  ;;  %v311_v14 = vld [vmem:[%s1574_s21 + $0x50] sm:$0xff] }
  0x17   : > { %1250 = vmatprep.subr.bf16.mxu1 %v1392_v2  ;;  %1234 = vmatprep.mubr.msk.bf16.mxu0 %vm348_vm0, %v317_v6  ;;  %v312_v15 = vld [vmem:[%s1574_s21 + $0x58] sm:$0xff]  ;;  %v307_v16 = vld [vmem:[%s1574_s21 + $0x30] sm:$0xff]  ;;  %v321_v17 = vpack.c.bf16 %v310_v13, %v309_v12  ;;  %v313_v19 = vld [vmem:[%s1574_s21 + $0x60] sm:$0xff] }
  0x18   : > { %v322_v18 = vpack.c.bf16 %v312_v15, %v311_v14  ;;  %v314_v20 = vld [vmem:[%s1574_s21 + $0x68] sm:$0xff]  ;;  %v308_v21 = vld [vmem:[%s1574_s21 + $0x38] sm:$0xff]  ;;  %v315_v24 = vld [vmem:[%s1574_s21 + $0x70] sm:$0xff]  ;;  %1274 = vmatprep.subr.bf16.mxu0 %v1396_v30 }
  0x19   : > { %1235 = vmatmul.mubr.msk.bf16.vlgmr.msra.gmra.mxu0 %vm348_vm0, %v318_v10  ;;  %v323_v22 = vpack.c.bf16 %v314_v20, %v313_v19  ;;  %1242 = vmatprep.mubr.msk.bf16.mxu1 %vm348_vm0, %v321_v17  ;;  %v320_v23 = vpack.c.bf16 %v308_v21, %v307_v16  ;;  %v316_v25 = vld [vmem:[%s1574_s21 + $0x78] sm:$0xff] }
  0x1a   : > { %1238 = vmatprep.mubr.msk.bf16.mxu0 %vm348_vm0, %v319_v11  ;;  %1243 = vmatmul.mubr.msk.bf16.vlgmr.msra.gmra.mxu1 %vm348_vm0, %v322_v18  ;;  %v324_v26 = vpack.c.bf16 %v316_v25, %v315_v24  ;;  %v1397_v24 = vld [vmem:[%s1786_s5 + $0x10] sm:$0xff]   ;;  %v1398_v25 = vld [vmem:[%s1786_s5 + $0x8] sm:$0xff]  }
  0x1b   : > { %1246 = vmatprep.mubr.msk.bf16.mxu1 %vm348_vm0, %v323_v22  ;;  %1251 = vmatpush3.bf16.msra.mxu1 %v1392_v2 }
  0x1c   : > { %1252 = vmatprep.subr.bf16.mxu1 %v1393_v27  ;;  %1275 = vmatpush3.bf16.msra.mxu0 %v1396_v30 }
  0x1d   : > { %1276 = vmatprep.subr.bf16.mxu0 %v1397_v24 }
  0x1f   : > { %1253 = vmatpush3.bf16.msra.mxu1 %v1393_v27 }
  0x20   : > { %1254 = vmatprep.subr.bf16.mxu1 %v1394_v28  ;;  %1277 = vmatpush3.bf16.msra.mxu0 %v1397_v24 }
  0x21   : > { %1239 = vmatmul.mubr.msk.bf16.gmra.mxu0 %vm348_vm0, %v320_v23  ;;  %1278 = vmatprep.subr.bf16.mxu0 %v1398_v25 }
  0x22   : > { %1247 = vmatmul.mubr.msk.bf16.gmra.mxu1 %vm348_vm0, %v324_v26  ;;  %v1399_v26 = vld [vmem:[%s1786_s5] sm:$0xff]  }
  0x23   : > { %1255 = vmatpush3.bf16.msra.mxu1 %v1394_v28 }
  0x24   : > { %1256 = vmatprep.subr.bf16.mxu1 %v1395_v29  ;;  %1279 = vmatpush3.bf16.msra.mxu0 %v1398_v25 }
  0x25   : > { %1280 = vmatprep.subr.bf16.mxu0 %v1399_v26 }
  0x27   : > { %1257 = vmatpush3.bf16.msra.mxu1 %v1395_v29  ;;  %v1150_v29 = vld [vmem:[%s1785_s4] ss:$0 sm:$0xff] }
  0x28   : > { %1281 = vmatpush3.bf16.msra.mxu0 %v1399_v26 }
  0xd9   : > { %v1236_v31 = vpop.f32.mrf.mxu0 }
  0xda   : > { %v1244_v34 = vpop.f32.mrf.mxu1  ;;  %v416_v39 = vadd.f32 %v1236_v31, %v1139_v33 }
  0xdb   : > { %v407_v32 = vpop.f32.mrf.mxu0  ;;  %v448_v10 = vadd.f32 %v1244_v34, %v1139_v33 }
  0xdc   : > { %v408_v36 = vadd.f32 %v1139_v33, %v407_v32  ;;  %v439_v38 = vpop.f32.mrf.mxu1  ;;  %v472_v48 = vmax.f32 %v416_v39, 0.0 }
  0xdd   : > { %v1237_v35 = vpop.f32.mrf.mxu0  ;;  %v440_v51 = vadd.f32 %v1139_v33, %v439_v38  ;;  %v480_v15 = vmax.f32 %v448_v10, 0.0 }
  0xde   : > { %v419_v37 = vadd.f32 %v1237_v35, %v1139_v33  ;;  %v1245_v42 = vpop.f32.mrf.mxu1  ;;  %v470_v45 = vmax.f32 %v408_v36, 0.0 }
  0xdf   : > { %v410_v40 = vpop.f32.mrf.mxu0  ;;  %v478_v61 = vmax.f32 %v440_v51, 0.0  ;;  %v451_v12 = vadd.f32 %v1245_v42, %v1139_v33 }
  0xe0   : > { %v411_v41 = vadd.f32 %v1139_v33, %v410_v40  ;;  %v473_v43 = vmax.f32 %v419_v37, 0.0  ;;  %v442_v47 = vpop.f32.mrf.mxu1 }
  0xe1   : > { %v1240_v44 = vpop.f32.mrf.mxu0  ;;  %v443_v52 = vadd.f32 %v1139_v33, %v442_v47  ;;  %v481_v16 = vmax.f32 %v451_v12, 0.0 }
  0xe2   : > { %v471_v46 = vmax.f32 %v411_v41, 0.0  ;;  %v1248_v53 = vpop.f32.mrf.mxu1  ;;  %v487_v54 = vpack.c.bf16 %v473_v43, %v472_v48  ;;  %v432_v59 = vadd.f32 %v1240_v44, %v1139_v33 }
  0xe3   : > { %v423_v49 = vpop.f32.mrf.mxu0  ;;  %v479_v63 = vmax.f32 %v443_v52, 0.0  ;;  %v491_v18 = vpack.c.bf16 %v481_v16, %v480_v15  ;;  %v464_v19 = vadd.f32 %v1248_v53, %v1139_v33 }
  0xe4   : > { %v486_v50 = vpack.c.bf16 %v471_v46, %v470_v45  ;;  %v424_v56 = vadd.f32 %v1139_v33, %v423_v49  ;;  %v455_v58 = vpop.f32.mrf.mxu1  ;;  %v476_v5 = vmax.f32 %v432_v59, 0.0 }
  0xe5   : > { %v1241_v55 = vpop.f32.mrf.mxu0  ;;  %v490_v7 = vpack.c.bf16 %v479_v63, %v478_v61  ;;  %v456_v8 = vadd.f32 %v1139_v33, %v455_v58  ;;  %v484_v21 = vmax.f32 %v464_v19, 0.0 }
  0xe6   : > { %v435_v57 = vadd.f32 %v1241_v55, %v1139_v33  ;;  %1258 = vmatprep.mubr.msk.bf16.mxu1 %vm533_vm1, %v486_v50  ;;  %v1249_v0 = vpop.f32.mrf.mxu1  ;;  %v474_v2 = vmax.f32 %v424_v56, 0.0 }
  0xe7   : > { %v426_v60 = vpop.f32.mrf.mxu0  ;;  %1259 = vmatmul.mubr.msk.bf16.vlgmr.msra.gmra.mxu1 %vm533_vm1, %v487_v54  ;;  %v482_v13 = vmax.f32 %v456_v8, 0.0  ;;  %v467_v20 = vadd.f32 %v1249_v0, %v1139_v33 }
  0xe8   : > { %v427_v62 = vadd.f32 %v1139_v33, %v426_v60  ;;  %v477_v1 = vmax.f32 %v435_v57, 0.0  ;;  %v458_v4 = vpop.f32.mrf.mxu1 }
  0xe9   : > { %v459_v9 = vadd.f32 %v1139_v33, %v458_v4  ;;  %v485_v22 = vmax.f32 %v467_v20, 0.0  ;;  %v1163_v20 = vld [vmem:[%s1787_s6] ss:$0 sm:$0xff] }
  0xea   : > { %v475_v3 = vmax.f32 %v427_v62, 0.0  ;;  %v489_v11 = vpack.c.bf16 %v477_v1, %v476_v5 }
  0xeb   : > { %v483_v14 = vmax.f32 %v459_v9, 0.0  ;;  %v493_v23 = vpack.c.bf16 %v485_v22, %v484_v21 }
  0xec   : > { %v488_v6 = vpack.c.bf16 %v475_v3, %v474_v2 }
  0xed   : > { %v492_v17 = vpack.c.bf16 %v483_v14, %v482_v13 }
  0xee   : > { %1262 = vmatprep.mubr.msk.bf16.mxu1 %vm533_vm1, %v488_v6 }
  0xef   : > { %1263 = vmatmul.mubr.msk.bf16.gmra.mxu1 %vm533_vm1, %v489_v11 }
  0xf0   : > { %1266 = vmatprep.mubr.msk.bf16.mxu1 %vm533_vm1, %v490_v7 }
  0xf7   : > { %1267 = vmatmul.mubr.msk.bf16.gmra.mxu1 %vm533_vm1, %v491_v18 }
  0xf8   : > { %1270 = vmatprep.mubr.msk.bf16.mxu1 %vm533_vm1, %v492_v17 }
  0xff   : > { %1271 = vmatmul.mubr.msk.bf16.gmra.mxu1 %vm533_vm1, %v493_v23 }
 0x1a7   : > { %v1260_v27 = vpop.f32.mrf.mxu1 }
 0x1a8   : > { %v601_v33 = vadd.f32 %v1260_v27, %v1150_v29 }
 0x1a9   : > { %v592_v28 = vpop.f32.mrf.mxu1 }
 0x1aa   : > { %v593_v31 = vadd.f32 %v1150_v29, %v592_v28  ;;  %v657_v40 = vmax.f32 %v601_v33, 0.0 }
 0x1ab   : > { %v1261_v30 = vpop.f32.mrf.mxu1 }
 0x1ac   : > { %v604_v32 = vadd.f32 %v1261_v30, %v1150_v29  ;;  %v655_v38 = vmax.f32 %v593_v31, 0.0 }
 0x1ad   : > { %v595_v34 = vpop.f32.mrf.mxu1 }
 0x1ae   : > { %v596_v35 = vadd.f32 %v1150_v29, %v595_v34  ;;  %v658_v36 = vmax.f32 %v604_v32, 0.0 }
 0x1af   : > { %v1264_v37 = vpop.f32.mrf.mxu1 }
 0x1b0   : > { %v656_v39 = vmax.f32 %v596_v35, 0.0  ;;  %v672_v43 = vpack.c.bf16 %v658_v36, %v657_v40  ;;  %v617_v47 = vadd.f32 %v1264_v37, %v1150_v29 }
 0x1b1   : > { %v608_v41 = vpop.f32.mrf.mxu1 }
 0x1b2   : > { %v671_v42 = vpack.c.bf16 %v656_v39, %v655_v38  ;;  %v609_v45 = vadd.f32 %v1150_v29, %v608_v41  ;;  %v661_v54 = vmax.f32 %v617_v47, 0.0 }
 0x1b3   : > { %v1265_v44 = vpop.f32.mrf.mxu1 }
 0x1b4   : > { %v620_v46 = vadd.f32 %v1265_v44, %v1150_v29  ;;  %1282 = vmatprep.mubr.msk.bf16.mxu0 %vm533_vm1, %v671_v42  ;;  %v659_v52 = vmax.f32 %v609_v45, 0.0 }
 0x1b5   : > { %v611_v48 = vpop.f32.mrf.mxu1  ;;  %1283 = vmatmul.mubr.msk.bf16.vlgmr.msra.gmra.mxu0 %vm533_vm1, %v672_v43 }
 0x1b6   : > { %v612_v49 = vadd.f32 %v1150_v29, %v611_v48  ;;  %v662_v50 = vmax.f32 %v620_v46, 0.0 }
 0x1b7   : > { %v1268_v51 = vpop.f32.mrf.mxu1 }
 0x1b8   : > { %v660_v53 = vmax.f32 %v612_v49, 0.0  ;;  %v674_v57 = vpack.c.bf16 %v662_v50, %v661_v54  ;;  %v633_v61 = vadd.f32 %v1268_v51, %v1150_v29 }
 0x1b9   : > { %v624_v55 = vpop.f32.mrf.mxu1 }
 0x1ba   : > { %v673_v56 = vpack.c.bf16 %v660_v53, %v659_v52  ;;  %v625_v59 = vadd.f32 %v1150_v29, %v624_v55  ;;  %v665_v4 = vmax.f32 %v633_v61, 0.0 }
 0x1bb   : > { %v1269_v58 = vpop.f32.mrf.mxu1 }
 0x1bc   : > { %v636_v60 = vadd.f32 %v1269_v58, %v1150_v29  ;;  %1286 = vmatprep.mubr.msk.bf16.mxu0 %vm533_vm1, %v673_v56  ;;  %v663_v2 = vmax.f32 %v625_v59, 0.0 }
 0x1bd   : > { %v627_v62 = vpop.f32.mrf.mxu1  ;;  %1287 = vmatmul.mubr.msk.bf16.gmra.mxu0 %vm533_vm1, %v674_v57 }
 0x1be   : > { %v628_v63 = vadd.f32 %v1150_v29, %v627_v62  ;;  %v666_v0 = vmax.f32 %v636_v60, 0.0 }
 0x1bf   : > { %v1272_v1 = vpop.f32.mrf.mxu1 }
 0x1c0   : > { %v664_v3 = vmax.f32 %v628_v63, 0.0  ;;  %v676_v7 = vpack.c.bf16 %v666_v0, %v665_v4  ;;  %v649_v11 = vadd.f32 %v1272_v1, %v1150_v29 }
 0x1c1   : > { %v640_v5 = vpop.f32.mrf.mxu1 }
 0x1c2   : > { %v675_v6 = vpack.c.bf16 %v664_v3, %v663_v2  ;;  %v641_v9 = vadd.f32 %v1150_v29, %v640_v5  ;;  %v669_v17 = vmax.f32 %v649_v11, 0.0 }
 0x1c3   : > { %v1273_v8 = vpop.f32.mrf.mxu1 }
 0x1c4   : > { %v652_v10 = vadd.f32 %v1273_v8, %v1150_v29  ;;  %1290 = vmatprep.mubr.msk.bf16.mxu0 %vm533_vm1, %v675_v6  ;;  %v667_v15 = vmax.f32 %v641_v9, 0.0 }
 0x1c5   : > { %v643_v12 = vpop.f32.mrf.mxu1  ;;  %1291 = vmatmul.mubr.msk.bf16.gmra.mxu0 %vm533_vm1, %v676_v7 }
 0x1c6   : > { %v644_v13 = vadd.f32 %v1150_v29, %v643_v12  ;;  %v670_v14 = vmax.f32 %v652_v10, 0.0 }
 0x1c8   : > { %v668_v16 = vmax.f32 %v644_v13, 0.0  ;;  %v678_v19 = vpack.c.bf16 %v670_v14, %v669_v17 }
 0x1ca   : > { %v677_v18 = vpack.c.bf16 %v668_v16, %v667_v15 }
 0x1cc   : > { %1294 = vmatprep.mubr.msk.bf16.mxu0 %vm533_vm1, %v677_v18 }
 0x1cd   : > { %1295 = vmatmul.mubr.msk.bf16.gmra.mxu0 %vm533_vm1, %v678_v19 }
 0x275   : > { %v1284_v21 = vpop.f32.mrf.mxu0 }
 0x276   : > { %v785_v22 = vadd.f32 %v1284_v21, %v1163_v20 }
 0x277   : > { %v776_v23 = vpop.f32.mrf.mxu0 }
 0x278   : > { %842 = vst.msk [vmem:[%s1647_s11 + $0x10] sm:$0xff] %vm839_vm2, %v785_v22  ;;  %v777_v24 = vadd.f32 %v1163_v20, %v776_v23 }
 0x279   : > { %v1285_v25 = vpop.f32.mrf.mxu0 }
 0x27a   : > { %840 = vst.msk [vmem:[%s1647_s11] sm:$0xff] %vm839_vm2, %v777_v24  ;;  %v788_v26 = vadd.f32 %v1285_v25, %v1163_v20 }
 0x27b   : > { %v779_v27 = vpop.f32.mrf.mxu0 }
 0x27c   : > { %843 = vst.msk [vmem:[%s1647_s11 + $0x18] sm:$0xff] %vm839_vm2, %v788_v26  ;;  %v780_v28 = vadd.f32 %v1163_v20, %v779_v27 }
 0x27d   : > { %v1288_v29 = vpop.f32.mrf.mxu0 }
 0x27e   : > { %841 = vst.msk [vmem:[%s1647_s11 + $0x8] sm:$0xff] %vm839_vm2, %v780_v28  ;;  %v801_v30 = vadd.f32 %v1288_v29, %v1163_v20 }
 0x27f   : > { %v792_v31 = vpop.f32.mrf.mxu0 }
 0x280   : > { %846 = vst.msk [vmem:[%s1647_s11 + $0x30] sm:$0xff] %vm839_vm2, %v801_v30  ;;  %v793_v32 = vadd.f32 %v1163_v20, %v792_v31 }
 0x281   : > { %v1289_v33 = vpop.f32.mrf.mxu0 }
 0x282   : > { %844 = vst.msk [vmem:[%s1647_s11 + $0x20] sm:$0xff] %vm839_vm2, %v793_v32  ;;  %v804_v34 = vadd.f32 %v1289_v33, %v1163_v20 }
 0x283   : > { %v795_v35 = vpop.f32.mrf.mxu0 }
 0x284   : > { %847 = vst.msk [vmem:[%s1647_s11 + $0x38] sm:$0xff] %vm839_vm2, %v804_v34  ;;  %v796_v36 = vadd.f32 %v1163_v20, %v795_v35 }
 0x285   : > { %v1292_v37 = vpop.f32.mrf.mxu0 }
 0x286   : > { %845 = vst.msk [vmem:[%s1647_s11 + $0x28] sm:$0xff] %vm839_vm2, %v796_v36  ;;  %v817_v38 = vadd.f32 %v1292_v37, %v1163_v20 }
 0x287   : > { %v808_v39 = vpop.f32.mrf.mxu0 }
 0x288   : > { %850 = vst.msk [vmem:[%s1647_s11 + $0x50] sm:$0xff] %vm839_vm2, %v817_v38  ;;  %v809_v40 = vadd.f32 %v1163_v20, %v808_v39 }
 0x289   : > { %v1293_v41 = vpop.f32.mrf.mxu0 }
 0x28a   : > { %848 = vst.msk [vmem:[%s1647_s11 + $0x40] sm:$0xff] %vm839_vm2, %v809_v40  ;;  %v820_v42 = vadd.f32 %v1293_v41, %v1163_v20 }
 0x28b   : > { %v811_v43 = vpop.f32.mrf.mxu0 }
 0x28c   : > { %851 = vst.msk [vmem:[%s1647_s11 + $0x58] sm:$0xff] %vm839_vm2, %v820_v42  ;;  %v812_v44 = vadd.f32 %v1163_v20, %v811_v43 }
 0x28d   : > { %v1296_v45 = vpop.f32.mrf.mxu0 }
 0x28e   : > { %849 = vst.msk [vmem:[%s1647_s11 + $0x48] sm:$0xff] %vm839_vm2, %v812_v44  ;;  %v833_v46 = vadd.f32 %v1296_v45, %v1163_v20 }
 0x28f   : > { %v824_v47 = vpop.f32.mrf.mxu0 }
 0x290   : > { %854 = vst.msk [vmem:[%s1647_s11 + $0x70] sm:$0xff] %vm839_vm2, %v833_v46  ;;  %v825_v48 = vadd.f32 %v1163_v20, %v824_v47 }
 0x291   : > { %v1297_v49 = vpop.f32.mrf.mxu0 }
 0x292   : > { %852 = vst.msk [vmem:[%s1647_s11 + $0x60] sm:$0xff] %vm839_vm2, %v825_v48  ;;  %v836_v50 = vadd.f32 %v1297_v49, %v1163_v20  ;;  %862 = sbr.rel (!%p1553_p4) target bundleno = 704 (0x2c0), region = 52 }
 0x293   : > { %v827_v51 = vpop.f32.mrf.mxu0 }
 0x294   : > { %855 = vst.msk [vmem:[%s1647_s11 + $0x78] sm:$0xff] %vm839_vm2, %v836_v50  ;;  %v828_v52 = vadd.f32 %v1163_v20, %v827_v51 }
 0x296   : > { %853 = vst.msk [vmem:[%s1647_s11 + $0x68] sm:$0xff] %vm839_vm2, %v828_v52 }
 0x297   : > { %s1797_s24 = smov (!%p865_p8, %s864_s24), 16 }
 0x298   : > { %s1178_s17 = sshll.u32 %s1797_s24, 7 }
 0x299   : > { %p1181_p9 = scmp.eq.s32.totalorder %s1178_s17, 0 }
 0x29a   : > { %s1694_s18 = sshrl.u32 (!%p1181_p9), %s1797_s24, 4 }
 0x29b   : > { %873 = sbr.rel (%p1181_p9) target bundleno = 704 (0x2c0), region = 56  ;;  %p1182_p10 = scmp.le.s32.totalorder (!%p1181_p9), %s1694_s18, 0 }
 0x2a0   : > { %1088 = sbr.rel (%p1182_p10) target bundleno = 687 (0x2af), region = 132  ;;  %s1790_s27 = smov (!%p1182_p10), %s1688_s16 }
 0x2a1   : > { %s1791_s9 = smov (!%p1182_p10), %s1647_s11  ;;  %s1703_s12 = smov (!%p1182_p10), 0  }
 0x2a2   : > { %s1705_s19 = smov (!%p1182_p10), 0  }
 0x2a5 LB: >> { %v966_v53 = vld [vmem:[%s1462_s9] sm:$0xff]  ;;  %v968_v54 = vld [vmem:[%s1462_s9 + $0x8] sm:$0xff]  ;;  %v970_v55 = vld [vmem:[%s1462_s9 + $0x10] sm:$0xff]  ;;  %s998_s20 = sadd.s32 1, %s1466_s12  ;;  %s960_s19 = sadd.s32 1, %s1470_s19   ;;  %s1470_s19 = sphi %s1705_s19, %s960_s19   ;;  %s1466_s12 = sphi %s1703_s12, %s1792_s12   ;;  %s1462_s9 = sphi %s1791_s9, %s1003_s9   ;;  %s1458_s27 = sphi %s1790_s27, %s1004_s27  }
 0x2a6   : >> { %967 = vst [vmem:[%s1458_s27] sm:$0xff] %v966_v53  ;;  %969 = vst [vmem:[%s1458_s27 + $0x8] sm:$0xff] %v968_v54  ;;  %v972_v56 = vld [vmem:[%s1462_s9 + $0x18] sm:$0xff]  ;;  %v974_v57 = vld [vmem:[%s1462_s9 + $0x20] sm:$0xff]  ;;  %p999_p11 = scmp.ge.s32.totalorder %s998_s20, %s1694_s18  ;;  %p959_p12 = scmp.ge.s32.totalorder %s960_s19, %s1694_s18 }
 0x2a7   : >> { %971 = vst [vmem:[%s1458_s27 + $0x10] sm:$0xff] %v970_v55  ;;  %v976_v58 = vld [vmem:[%s1462_s9 + $0x28] sm:$0xff]  ;;  %973 = vst [vmem:[%s1458_s27 + $0x18] sm:$0xff] %v972_v56  ;;  %v978_v59 = vld [vmem:[%s1462_s9 + $0x30] sm:$0xff] }
 0x2a8   : >> { %975 = vst [vmem:[%s1458_s27 + $0x20] sm:$0xff] %v974_v57  ;;  %977 = vst [vmem:[%s1458_s27 + $0x28] sm:$0xff] %v976_v58  ;;  %v980_v60 = vld [vmem:[%s1462_s9 + $0x38] sm:$0xff]  ;;  %v982_v61 = vld [vmem:[%s1462_s9 + $0x40] sm:$0xff]  ;;  %s1799_s20 = smov (%p999_p11, %s998_s20), 0 }
 0x2a9   : >> { %979 = vst [vmem:[%s1458_s27 + $0x30] sm:$0xff] %v978_v59  ;;  %981 = vst [vmem:[%s1458_s27 + $0x38] sm:$0xff] %v980_v60  ;;  %v984_v62 = vld [vmem:[%s1462_s9 + $0x48] sm:$0xff]  ;;  %v986_v63 = vld [vmem:[%s1462_s9 + $0x50] sm:$0xff]  ;;  %s1183_s21 = sshll.u32 %s1799_s20, 7  ;;  %s1792_s12 = smov %s1799_s20 }
 0x2aa   : >> { %983 = vst [vmem:[%s1458_s27 + $0x40] sm:$0xff] %v982_v61  ;;  %v988_v0 = vld [vmem:[%s1462_s9 + $0x58] sm:$0xff]  ;;  %985 = vst [vmem:[%s1458_s27 + $0x48] sm:$0xff] %v984_v62  ;;  %v990_v1 = vld [vmem:[%s1462_s9 + $0x60] sm:$0xff]  ;;  %962 = sbr.rel (!%p959_p12) target bundleno = 677 (0x2a5), region = 138 }
 0x2ab   : >> { %987 = vst [vmem:[%s1458_s27 + $0x50] sm:$0xff] %v986_v63  ;;  %989 = vst [vmem:[%s1458_s27 + $0x58] sm:$0xff] %v988_v0  ;;  %v992_v2 = vld [vmem:[%s1462_s9 + $0x68] sm:$0xff]  ;;  %v994_v3 = vld [vmem:[%s1462_s9 + $0x70] sm:$0xff] }
 0x2ac   : >> { %991 = vst [vmem:[%s1458_s27 + $0x60] sm:$0xff] %v990_v1  ;;  %993 = vst [vmem:[%s1458_s27 + $0x68] sm:$0xff] %v992_v2  ;;  %v996_v4 = vld [vmem:[%s1462_s9 + $0x78] sm:$0xff]  ;;  %s1003_s9 = scalar_lea.vmem %s1647_s11, %s1183_s21 [#allocation2]  }
 0x2ad   : >> { %995 = vst [vmem:[%s1458_s27 + $0x70] sm:$0xff] %v994_v3  ;;  %997 = vst [vmem:[%s1458_s27 + $0x78] sm:$0xff] %v996_v4  ;;  %s1004_s27 = scalar_lea.vmem %s1688_s16, %s1183_s21  }
 0x2af PF: > { %s1763_s22 = sand.u32 15, %s1797_s24   ;;  %s1194_s23 = sshll.u32 %s1694_s18, 7 }
 0x2b0   : > { %s1009_s26 = scalar_lea.vmem %s1647_s11, %s1194_s23 [#allocation2]   ;;  %s1011_s29 = scalar_lea.vmem %s1688_s16, %s1194_s23  }
 0x2b1   : > { %p1188_p13 = scmp.le.s32.totalorder %s1763_s22, 0 }
 0x2b2   : > { %s1472_s30 = smov (!%p1188_p13), %s1011_s29   ;;  %s1476_s10 = smov (!%p1188_p13), %s1009_s26  }
 0x2b3   : > { %1102 = sbr.rel (%p1188_p13) target bundleno = 704 (0x2c0), region = 143  ;;  %s1480_s13 = smov (!%p1188_p13), 0  }
 0x2b4   : > { %s1484_s14 = smov (!%p1188_p13), 0  }
 0x2b8 LB: >> { %v1021_v5 = vld [vmem:[%s1478_s10] sm:$0xff]  ;;  %s1023_s24 = sadd.s32 1, %s1482_s13  ;;  %s1015_s14 = sadd.s32 1, %s1486_s14   ;;  %s1486_s14 = sphi %s1484_s14, %s1015_s14   ;;  %s1482_s13 = sphi %s1480_s13, %s1481_s13   ;;  %s1478_s10 = sphi %s1476_s10, %s1028_s10   ;;  %s1474_s30 = sphi %s1472_s30, %s1029_s30  }
 0x2b9   : >> { %1022 = vst [vmem:[%s1474_s30] sm:$0xff] %v1021_v5  ;;  %p1024_p0 = scmp.ge.s32.totalorder %s1023_s24, %s1763_s22  ;;  %p1014_p1 = scmp.ge.s32.totalorder %s1015_s14, %s1763_s22 }
 0x2bb   : >> { %s1801_s24 = smov (%p1024_p0, %s1023_s24), 0  ;;  %1017 = sbr.rel (!%p1014_p1) target bundleno = 696 (0x2b8), region = 149 }
 0x2bc   : >> { %s1189_s11 = sshll.u32 %s1801_s24, 3  ;;  %s1481_s13 = smov %s1801_s24  }
 0x2bd   : >> { %s1028_s10 = scalar_lea.vmem %s1009_s26, %s1189_s11 [#allocation2]   ;;  %s1029_s30 = scalar_lea.vmem %s1011_s29, %s1189_s11  }
 0x2c0 PF: > { %p14_p2 = scmp.ge.s32.totalorder %s1543_s28, 5   ;;  %s1793_s24 = smov %s1450_s25 }
 0x2c1   : > { %s1794_s25 = smov %s1551_s8  ;;  %s1795_s26 = smov %s1543_s28 }
 0x2c2   :  { %16 = sbr.rel (!%p14_p2) target bundleno = 2 (0x2), region = 160 }

</bundles_post_ra>
